<compile_context>
chip_gen: v7x
topology: tpu7x:2x2x1
jax: 0.10.0
libtpu: 0.0.40
codegen_flags: <defaults>
</compile_context>

<pallas_src>
import functools
import math

import numpy as np

import jax
import jax.numpy as jnp
from jax.experimental import pallas as pl
from jax.experimental.pallas import tpu as pltpu


# ------------------------ module configuration (FramePack usage) -------------
NUM_CHANNELS = 256          # embedding_dim (even -> no pad column needed)
FLIP_SIN_TO_COS = True
DOWNSCALE_FREQ_SHIFT = 0.0
SCALE = 1.0
MAX_PERIOD = 10000
N_TIMESTEPS = 8             # small example batch of timesteps


def _timesteps_kernel(freqs_ref, t_ref, out_ref, *, half_pad, flip_sin_to_cos):
    # freqs_ref: [1, half_pad] precomputed frequencies (scale already folded in)
    # t_ref:     [N, 1] timesteps (f32)
    # out_ref:   [N, 2 * half_pad]
    ang = t_ref[...] * freqs_ref[...]            # [N, half_pad] via lane broadcast

    sin_part = jnp.sin(ang)
    cos_part = jnp.cos(ang)

    # flip_sin_to_cos is a static Python bool -> resolved at trace time.
    if flip_sin_to_cos:
        first, second = cos_part, sin_part       # [cos, sin]
    else:
        first, second = sin_part, cos_part       # [sin, cos]

    # half_pad is a multiple of 128 -> both stores are unmasked full-vreg vst.
    out_ref[:, :half_pad] = first
    out_ref[:, half_pad:] = second


@functools.partial(
    jax.jit,
    static_argnames=("num_channels", "flip_sin_to_cos",
                     "downscale_freq_shift", "scale", "max_period"),
)
def timesteps_forward(timesteps, *, num_channels, flip_sin_to_cos,
                      downscale_freq_shift, scale=1.0, max_period=10000):
    assert timesteps.ndim == 1, "Timesteps should be a 1d-array"

    n = timesteps.shape[0]
    half_dim = num_channels // 2
    # Pad the lane axis up to a multiple of 128 so stores stay unmasked.
    half_pad = max(128, ((half_dim + 127) // 128) * 128)

    # ---- constant-fold the frequency table (numpy, trace time) -------------
    exponent = -math.log(max_period) * np.arange(half_dim, dtype=np.float32)
    exponent = exponent / (half_dim - float(downscale_freq_shift))
    freqs_np = np.exp(exponent) * float(scale)           # [half_dim]
    freqs_np = np.pad(freqs_np, (0, half_pad - half_dim))  # zero padding cols
    freqs = jnp.asarray(freqs_np.reshape(1, half_pad), dtype=jnp.float32)

    t2d = timesteps.astype(jnp.float32).reshape(n, 1)

    kernel = functools.partial(
        _timesteps_kernel,
        half_pad=half_pad,
        flip_sin_to_cos=flip_sin_to_cos,
    )

    cost = pl.CostEstimate(
        flops=2 * n * half_pad,                       # one mul + (cheap) adds
        transcendentals=2 * n * half_pad,             # sin + cos
        bytes_accessed=4 * (n * 1 + half_pad + n * 2 * half_pad),
    )

    # Whole problem is a few KiB: single grid-less invocation, everything in
    # VMEM, no pipelining / per-step launch overhead.
    out = pl.pallas_call(
        kernel,
        out_shape=jax.ShapeDtypeStruct((n, 2 * half_pad), jnp.float32),
        in_specs=[
            pl.BlockSpec(memory_space=pltpu.MemorySpace.VMEM),  # freqs
            pl.BlockSpec(memory_space=pltpu.MemorySpace.VMEM),  # timesteps
        ],
        out_specs=pl.BlockSpec(memory_space=pltpu.MemorySpace.VMEM),
        cost_estimate=cost,
    )(freqs, t2d)

    # Strip lane padding (no-op for num_channels == 256).
    if half_pad != half_dim:
        out = jnp.concatenate(
            [out[:, :half_dim], out[:, half_pad:half_pad + half_dim]], axis=-1)
    # Odd embedding_dim: trailing zero-pad column (matches F.pad in reference).
    if num_channels % 2 == 1:
        out = jnp.pad(out, ((0, 0), (0, 1)))
    return out


def reference_timesteps(timesteps, num_channels, flip_sin_to_cos,
                        downscale_freq_shift, scale=1.0, max_period=10000):
    """Pure-JAX mirror of get_timestep_embedding (the PyTorch reference)."""
    half_dim = num_channels // 2
    exponent = -math.log(max_period) * jnp.arange(half_dim, dtype=jnp.float32)
    exponent = exponent / (half_dim - downscale_freq_shift)
    emb = jnp.exp(exponent)
    emb = timesteps.astype(jnp.float32)[:, None] * emb[None, :]
    emb = scale * emb
    emb = jnp.concatenate([jnp.sin(emb), jnp.cos(emb)], axis=-1)
    if flip_sin_to_cos:
        emb = jnp.concatenate([emb[:, half_dim:], emb[:, :half_dim]], axis=-1)
    if num_channels % 2 == 1:
        emb = jnp.pad(emb, ((0, 0), (0, 1)))
    return emb


if __name__ == "__main__":
    key = jax.random.PRNGKey(0)
    # Fractional diffusion timesteps in [0, 1000), one per batch element.
    timesteps = jax.random.uniform(key, (N_TIMESTEPS,), jnp.float32,
                                   minval=0.0, maxval=1000.0)

    out = timesteps_forward(
        timesteps,
        num_channels=NUM_CHANNELS,
        flip_sin_to_cos=FLIP_SIN_TO_COS,
        downscale_freq_shift=DOWNSCALE_FREQ_SHIFT,
        scale=SCALE,
        max_period=MAX_PERIOD,
    )
    out = jax.block_until_ready(out)

    ref = reference_timesteps(timesteps, NUM_CHANNELS, FLIP_SIN_TO_COS,
                              DOWNSCALE_FREQ_SHIFT, SCALE, MAX_PERIOD)

    assert out.shape == (N_TIMESTEPS, NUM_CHANNELS)
    # Tolerance absorbs minor differences between Mosaic and XLA sin/cos
    # range-reduction at arguments up to ~1000 rad (values are in [-1, 1]).
    assert jnp.allclose(out, ref, atol=2e-3, rtol=0.0), "mismatch vs reference"

    print("KERNEL_OK")
</pallas_src>

<mosaic_0001>
module attributes {stable_mosaic.version = 11 : i64} {
  func.func @_timesteps_kernel(%arg0: memref<1x128xf32, #tpu.memory_space<vmem>>, %arg1: memref<8x1xf32, #tpu.memory_space<vmem>>, %arg2: memref<8x256xf32, #tpu.memory_space<vmem>>) attributes {dimension_semantics = [], scalar_prefetch = 0 : i64, scratch_operands = 0 : i64, tpu.core_type = #tpu.core_type<tc>} {
    %c0 = arith.constant 0 : index
    %c0_0 = arith.constant 0 : index
    %0 = vector.load %arg1[%c0, %c0_0] : memref<8x1xf32, #tpu.memory_space<vmem>>, vector<8x1xf32>
    %c0_1 = arith.constant 0 : index
    %c0_2 = arith.constant 0 : index
    %1 = vector.load %arg0[%c0_1, %c0_2] : memref<1x128xf32, #tpu.memory_space<vmem>>, vector<1x128xf32>
    %2 = vector.broadcast %0 : vector<8x1xf32> to vector<8x128xf32>
    %3 = vector.broadcast %1 : vector<1x128xf32> to vector<8x128xf32>
    %4 = arith.mulf %2, %3 : vector<8x128xf32>
    %5 = math.sin %4 : vector<8x128xf32>
    %6 = math.cos %4 : vector<8x128xf32>
    %c0_3 = arith.constant 0 : index
    %c0_4 = arith.constant 0 : index
    %7 = vector.load %arg2[%c0_3, %c0_4] : memref<8x256xf32, #tpu.memory_space<vmem>>, vector<8x128xf32>
    tpu.vector_store %arg2[%c0_3, %c0_4], %6 {strides = array<i32>} : memref<8x256xf32, #tpu.memory_space<vmem>>, vector<8x128xf32>,
    %c0_5 = arith.constant 0 : index
    %c128 = arith.constant 128 : index
    %8 = vector.load %arg2[%c0_5, %c128] : memref<8x256xf32, #tpu.memory_space<vmem>>, vector<8x128xf32>
    tpu.vector_store %arg2[%c0_5, %c128], %5 {strides = array<i32>} : memref<8x256xf32, #tpu.memory_space<vmem>>, vector<8x128xf32>,
    return
  }
}

</mosaic_0001>

<bundles_post_ra>
// kernel: timesteps_forward.1
= control target key start
LH: loop header
LB: loop body
LE: loop exit
PB: predicated region body
PF: predicated region fallthrough
CT: control target
= control target key end

     0   :  { %v299_v1 = vmov 0   ;;  %s361_s0 = inlined_call_operand.vmem [shape: f32[1,128], index: 0, kind: input, shape index: {}]   ;;  %s362_s1 = inlined_call_operand.vmem [shape: f32[8,1], index: 1, kind: input, shape index: {}]   ;;  %s363_s2 = inlined_call_operand.hbm [shape: f32[8,256], index: 2, kind: output, shape index: {}]  }
   0x1   :  { %v12_v0 = vld [vmem:[%s362_s1] sm:$0xff]  ;;  %270 = vset.pattern.permute.xlu0 %v299_v1 }
   0x2   :  { %16 = vperm.xlu0 %270, %v12_v0  }
   0x3   :  { %7 = vsyncpa [#allocation3], 0  ;;  %v249_v2 = vld [vmem:[%s361_s0] ss:$0 sm:$0xff]  ;;  %v300_v15 = vmov 683565275  }
   0x4   :  { %v301_v17 = vmov 2475754826   ;;  %v302_v20 = vmov 2131351028   ;;  %v303_v23 = vmov 2102212464  }
   0x5   :  { %v304_v26 = vmov 920167782   ;;  %v305_v29 = vmov 1326507024   ;;  %s306_s0 = smov [#allocation2]  }
   0x6   :  { %s241_s1 = sshll.u32 %s306_s0, 4  ;;  %s242_s1 = int_to_ptr.vmem [resolvable:$true] %s241_s1 }
   0x7   :  { %s275_s13 = scalar_lea.vmem %s242_s1, 256  ;;  %p280_p1 = scmp.lt.s32.totalorder %s242_s1, %s242_s1 }
   0x8   :  { %p276_p0 = scmp.ne.s32.totalorder %s242_s1, %s275_s13  ;;  %p281_p2 = scmp.lt.s32.totalorder %s275_s13, %s275_s13 }
   0xa   :  { %p282_p3 = por %p281_p2, %p280_p1 }
   0xc   :  { %p283_p4 = pnand %p282_p3, %p276_p0 }
  0x81   :  { %v17_v3 = vpop.permute.xlu0 %16 }
  0x82   :  { %v328_v4 = vmul.f32 %v249_v2, %v17_v3 }
  0x84   :  { %v29_v5 = vand.u32 2139095040, %v328_v4  ;;  %v26_v9 = vand.u32 2147483647, %v328_v4  ;;  %vm28_vm7 = vcmp.lt.s32.totalorder %v328_v4, 0  ;;  %vm118_vm15 = vweird.f32 %v328_v4 }
  0x86   :  { %v30_v6 = vshrl.u32 %v29_v5, 23  ;;  %v33_v12 = vand.u32 8388607, %v26_v9  ;;  %vm27_vm8 = vcmp.le.f32.partialorder %v26_v9, 0.7853982 }
  0x88   :  { %v250_v7 = vadd.s32 4294967169, %v30_v6  ;;  %v34_v31 = vor.u32 8388608, %v33_v12 }
  0x8a   :  { %v36_v8 = vadd.s32 1, %v250_v7  ;;  %v74_v45 = vshll.u32 %v34_v31, 8 }
  0x8c   :  { %vm37_vm0 = vcmp.gt.s32.totalorder %v36_v8, 0 }
  0x8d   :  { %v38_v10 = vsel %vm37_vm0, %v36_v8, 0 }
  0x8e   :  { %v40_v11 = vand.u32 31, %v38_v10  ;;  %v39_v14 = vshrl.u32 %v38_v10, 5 }
  0x90   :  { %v41_v13 = vsub.s32 32, %v40_v11  ;;  %v43_v16 = vshll.u32 %v300_v15, %v40_v11  ;;  %v46_v18 = vshll.u32 %v301_v17, %v40_v11  ;;  %v49_v22 = vshll.u32 %v302_v20, %v40_v11 }
  0x91   :  { %v52_v25 = vshll.u32 %v303_v23, %v40_v11  ;;  %v55_v28 = vshll.u32 %v304_v26, %v40_v11  ;;  %vm58_vm1 = vcmp.lt.s32.totalorder %v39_v14, 1  ;;  %vm61_vm2 = vcmp.lt.s32.totalorder %v39_v14, 4 }
  0x92   :  { %v44_v19 = vshrl.u32 %v301_v17, %v41_v13  ;;  %v47_v21 = vshrl.u32 %v302_v20, %v41_v13  ;;  %v50_v24 = vshrl.u32 %v303_v23, %v41_v13  ;;  %v53_v27 = vshrl.u32 %v304_v26, %v41_v13 }
  0x93   :  { %v56_v30 = vshrl.u32 %v305_v29, %v41_v13  ;;  %v42_v40 = vshrl.u32 %v300_v15, %v41_v13  ;;  %vm60_vm3 = vcmp.lt.s32.totalorder %v39_v14, 3  ;;  %vm59_vm4 = vcmp.lt.s32.totalorder %v39_v14, 2 }
  0x94   :  { %v45_v32 = vor.u32 %v44_v19, %v43_v16  ;;  %v48_v33 = vor.u32 %v47_v21, %v46_v18  ;;  %v51_v34 = vor.u32 %v50_v24, %v49_v22  ;;  %v54_v35 = vor.u32 %v53_v27, %v52_v25 }
  0x95   :  { %v57_v36 = vor.u32 %v56_v30, %v55_v28 }
  0x96   :  { %v63_v37 = vsel %vm61_vm2, %v51_v34, 2102212464  ;;  %v66_v38 = vsel %vm58_vm1, %v45_v32, %v48_v33  ;;  %v70_v39 = vsel %vm58_vm1, %v48_v33, %v51_v34  ;;  %v67_v41 = vsel %vm61_vm2, %v54_v35, 920167782 }
  0x97   :  { %v71_v42 = vsel %vm61_vm2, %v57_v36, 1326507024  ;;  %v68_v43 = vsel %vm60_vm3, %v51_v34, %v67_v41  ;;  %v62_v46 = vsel %vm58_vm1, %v42_v40, %v45_v32  ;;  %v64_v47 = vsel %vm60_vm3, %v48_v33, %v63_v37 }
  0x98   :  { %v72_v44 = vsel %vm60_vm3, %v54_v35, %v71_v42  ;;  %v69_v48 = vsel %vm59_vm4, %v66_v38, %v68_v43  ;;  %v65_v54 = vsel %vm59_vm4, %v62_v46, %v64_v47 }
  0x99   :  { %v73_v49 = vsel %vm59_vm4, %v70_v39, %v72_v44  ;;  %v337_v52 = vmul.u32.u64.low %v74_v45, %v69_v48  ;;  %v338_v53 = vmul.u32.u64.high %v74_v45, %v69_v48, %v337_v52  ;;  %v81_v56 = vmul.u32 %v74_v45, %v65_v54 }
  0x9a   :  { %v334_v50 = vmul.u32.u64.low %v74_v45, %v73_v49  ;;  %v335_v51 = vmul.u32.u64.high %v74_v45, %v73_v49, %v334_v50 }
  0x9b   :  { %v84_v55 = vadd.s32 1, %v338_v53 }
  0x9c   :  { %vm83_vm5 = vc.u32 %v335_v51, %v337_v52  ;;  %v82_v5 = vadd.s32 %v337_v52, %v335_v51 }
  0x9d   :  { %v85_v57 = vsel %vm83_vm5, %v84_v55, %v338_v53 }
  0x9e   :  { %v86_v58 = vadd.s32 %v85_v57, %v81_v56 }
  0xa0   :  { %v87_v59 = vadd.s32 536870912, %v86_v58 }
  0xa2   :  { %v88_v60 = vshrl.u32 %v87_v59, 30 }
  0xa4   :  { %v89_v61 = vshll.u32 %v88_v60, 30  ;;  %v112_v18 = vsub.s32 4, %v88_v60 }
  0xa6   :  { %v90_v62 = vsub.s32 %v86_v58, %v89_v61  ;;  %v113_v21 = vsel %vm28_vm7, %v112_v18, %v88_v60 }
  0xa7   :  { %v115_v23 = vsel %vm27_vm8, 0, %v113_v21 }
  0xa8   :  { %v92_v63 = vsub.s32 0, %v90_v62  ;;  %v119_v24 = vadd.s32 3, %v115_v23  ;;  %v223_v26 = vand.u32 3, %v115_v23 }
  0xaa   :  { %v251_v0 = vmin.u32 %v92_v63, %v90_v62  ;;  %v120_v25 = vand.u32 3, %v119_v24  ;;  %vm228_vm10 = vcmp.eq.s32.totalorder %v223_v26, 2  ;;  %vm225_vm12 = vcmp.eq.s32.totalorder %v223_v26, 0 }
  0xab   :  { %vm224_vm14 = vcmp.lt.s32.totalorder %v223_v26, 2 }
  0xac   :  { %v94_v1 = vclz %v251_v0  ;;  %vm125_vm9 = vcmp.eq.s32.totalorder %v120_v25, 2  ;;  %vm122_vm11 = vcmp.eq.s32.totalorder %v120_v25, 0  ;;  %vm121_vm13 = vcmp.lt.s32.totalorder %v120_v25, 2 }
  0xae   :  { %v252_v2 = vadd.s32 4294967294, %v94_v1 }
  0xb0   :  { %vm253_vm6 = vcmp.lt.s32.totalorder %v252_v2, 0 }
  0xb1   :  { %v97_v3 = vsel %vm253_vm6, 0, %v252_v2 }
  0xb2   :  { %v98_v6 = vsub.s32 32, %v97_v3  ;;  %v102_v7 = vsub.s32 4294967266, %v97_v3  ;;  %v99_v8 = vshll.u32 %v90_v62, %v97_v3 }
  0xb4   :  { %v100_v10 = vshrl.u32 %v82_v5, %v98_v6  ;;  %v103_v11 = vadd.s32 127, %v102_v7 }
  0xb6   :  { %v101_v12 = vor.u32 %v100_v10, %v99_v8  ;;  %v104_v13 = vshll.u32 %v103_v11, 23 }
  0xb8   :  { %v105_v14 = vor.u32 4788187, %v104_v13  ;;  %v108_v16 = vcvt.s32.f32 %v101_v12 }
  0xba   :  { %v106_v15 = vand.u32 2147483647, %v105_v14 }
  0xbc   :  { %v109_v17 = vmul.f32 %v108_v16, %v106_v15 }
  0xbe   :  { %v110_v19 = vxor.u32 2147483648, %v109_v17 }
  0xc0   :  { %v111_v20 = vsel %vm28_vm7, %v110_v19, %v109_v17 }
  0xc1   :  { %v114_v22 = vsel %vm27_vm8, %v328_v4, %v111_v20 }
  0xc2   :  { %271 = vcosq.f32 %v114_v22 }
  0xc3   :  { %273 = vsinq.f32 %v114_v22 }
  0xcc   :  { %v272_v27 = vpop.eup %271 }
  0xcd   :  { %v274_v28 = vpop.eup %273  ;;  %v126_v29 = vxor.u32 2147483648, %v272_v27 }
  0xce   :  { %v123_v30 = vxor.u32 2147483648, %v274_v28 }
  0xcf   :  { %v127_v9 = vsel %vm125_vm9, %v126_v29, %v274_v28  ;;  %v230_v31 = vsel %vm228_vm10, %v126_v29, %v274_v28 }
  0xd0   :  { %v124_v32 = vsel %vm122_vm11, %v272_v27, %v123_v30  ;;  %v227_v33 = vsel %vm225_vm12, %v272_v27, %v123_v30 }
  0xd1   :  { %v128_v34 = vsel %vm121_vm13, %v124_v32, %v127_v9  ;;  %v231_v35 = vsel %vm224_vm14, %v227_v33, %v230_v31 }
  0xd2   :  { %v129_v36 = vsel %vm118_vm15, nan, %v128_v34  ;;  %v232_v37 = vsel %vm118_vm15, nan, %v231_v35 }
  0xd3   :  { %233 = vst [vmem:[#allocation2] sm:$0xff] %v232_v37  ;;  %234 = vst [vmem:[#allocation2 + $0x8] sm:$0xff] %v129_v36 }
  0xd4   :  { %286 = shalt.err (!%p283_p4)
}
  0xd5   :  { %s287_s16 = scalar_lea.hbm %s363_s2, 256 }
  0xd6   :  { %p288_p5 = scmp.ne.s32.totalorder %s363_s2, %s287_s16  ;;  %p291_p6 = scmp.lt.u32.totalorder %s287_s16, %s363_s2 }
  0xd8   :  { %p293_p7 = pnand %p291_p6, %p288_p5 }
  0xda   :  { %296 = shalt.err (!%p293_p7)
}
  0xdb   :  { %244 = dma.vmem_to_hbm [thread:$0]  %s242_s1, 256, %s363_s2, [#allocation3]  }
  0xdc   :  { %297 = dma.done.wait [#allocation3], 256  }
  0xdd   :  { %298 = vsyncadd [#allocation3], 4294967040 }
  0xde   :  { %248 = vsyncpa [#allocation3], 1 }

</bundles_post_ra>
